<compile_context>
chip_gen: v6e
topology: v6e:2x2x1
jax: 0.10.0
libtpu: 0.0.40
codegen_flags: <defaults>
</compile_context>

<pallas_src>
import functools

import jax
import jax.numpy as jnp
from jax.experimental import pallas as pl
from jax.experimental.pallas import tpu as pltpu


# --------------------------- in-kernel helpers ------------------------------

def _log_softmax_rows(x):
    # Row-wise log_softmax with keepdims reductions.
    m = jnp.max(x, axis=1, keepdims=True)
    return x - (m + jnp.log(jnp.sum(jnp.exp(x - m), axis=1, keepdims=True)))


def _recip(x):
    # EUP approx reciprocal + one Newton-Raphson step: moves the divide off the
    # VPU tail while staying well inside the 1e-4 numerics check (raw approx is
    # only ~2^-12 relative error).
    r = pl.reciprocal(x, approx=True)
    return r * (2.0 - x * r)


# ------------------------------ fused kernel --------------------------------

def _cfair_fwd_kernel(x_ref, la_ref, rw_ref, b_ref, *rest,
                      n_enc, n_cls, n_adv, num_classes, num_groups,
                      cls_w0_out, bias_slices, adv_scale):
    n_w = n_enc + 1 + (n_cls - 1) + (n_adv - 1)
    w_refs = rest[:n_w]
    pre_ref, loss_ref = rest[n_w], rest[n_w + 1]

    def bias(i):
        off, width = bias_slices[i]
        return b_ref[:, off:off + width]            # static (1, width) lane slice

    wi = bi = 0

    # ---- encoder MLP (ReLU on hidden layers) ----
    h = x_ref[...]
    for i in range(n_enc):
        h = jnp.dot(h, w_refs[wi][...],
                    preferred_element_type=jnp.float32) + bias(bi)
        wi += 1
        bi += 1
        if i < n_enc - 1:
            h = jnp.maximum(h, 0.0)
    h_relu = h                                       # (B, zdim)

    # ---- fused first layer: classifier L0 + all C discriminator L0 ----
    z = jnp.dot(h_relu, w_refs[wi][...],
                preferred_element_type=jnp.float32) + bias(bi)
    wi += 1
    bi += 1
    cls_h = z[:, :cls_w0_out]
    disc_h = z[:, cls_w0_out:]
    if n_cls > 1:
        cls_h = jnp.maximum(cls_h, 0.0)
    if n_adv > 1:
        disc_h = jnp.maximum(disc_h, 0.0)

    # ---- classifier remaining layers ----
    for l in range(1, n_cls):
        cls_h = jnp.dot(cls_h, w_refs[wi][...],
                        preferred_element_type=jnp.float32) + bias(bi)
        wi += 1
        bi += 1
        if l < n_cls - 1:
            cls_h = jnp.maximum(cls_h, 0.0)
    p = cls_h                                        # (B, num_classes)
    pre_ref[...] = p

    # ---- discriminator remaining layers: ONE block-diagonal matmul each ----
    # Zero off-diagonal blocks make this exactly equal to the C per-class matmuls.
    for l in range(1, n_adv):
        disc_h = jnp.dot(disc_h, w_refs[wi][...],
                         preferred_element_type=jnp.float32) + bias(bi)
        wi += 1
        bi += 1
        if l < n_adv - 1:
            disc_h = jnp.maximum(disc_h, 0.0)
    d_all = disc_h                                   # (B, C*num_groups)

    B = p.shape[0]
    labels = la_ref[:, 0:1]                          # (B, 1) int32
    attrs = la_ref[:, 1:2]                           # (B, 1) int32

    # ---- loop-invariant one-hots (hoisted out of the class loop) ----
    col_c = jax.lax.broadcasted_iota(jnp.int32, (B, num_classes), 1)
    onehot_y = (col_c == labels).astype(jnp.float32)            # (B, C)
    col_g = jax.lax.broadcasted_iota(jnp.int32, (B, num_groups), 1)
    onehot_a = (col_g == attrs).astype(jnp.float32)             # (B, NG)

    # ---- main NLL (all rows, target reweighting; no mask multiply) ----
    rwt = rw_ref[:, :num_classes]                    # (1, C)
    logp = _log_softmax_rows(p)
    picked_logp = jnp.sum(logp * onehot_y, axis=1, keepdims=True)   # (B, 1)
    picked_w = jnp.sum(rwt * onehot_y, axis=1, keepdims=True)       # (B, 1)
    main_num = jnp.sum(picked_w * (-picked_logp), keepdims=True)    # (1, 1)
    main_den = jnp.sum(picked_w, keepdims=True)                     # (1, 1)
    main = main_num * _recip(main_den)

    # ---- adversarial NLL per class (masked rows; empty-class guarded) ----
    # Evaluating every discriminator on all rows + mask-weighting num AND den is
    # loss-equivalent to PyTorch's masked-row evaluation (log_softmax is row-wise).
    adv_sum = jnp.zeros((1, 1), jnp.float32)
    for j in range(num_classes):                     # static unroll, C is tiny
        dj = d_all[:, j * num_groups:(j + 1) * num_groups]          # (B, NG)
        logp_j = _log_softmax_rows(dj)
        wj = rw_ref[:, num_classes + j * num_groups:
                       num_classes + (j + 1) * num_groups]          # (1, NG)
        picked_lp_j = jnp.sum(logp_j * onehot_a, axis=1, keepdims=True)
        picked_w_j = jnp.sum(wj * onehot_a, axis=1, keepdims=True)
        mask_j = onehot_y[:, j:j + 1]                               # (B, 1)
        num_j = jnp.sum(mask_j * picked_w_j * (-picked_lp_j), keepdims=True)
        den_j = jnp.sum(mask_j * picked_w_j, keepdims=True)
        safe_den = jnp.where(den_j > 0.0, den_j, 1.0)
        # den==0 (class absent): return 0 instead of PyTorch's NaN (documented).
        adv_sum = adv_sum + jnp.where(den_j > 0.0,
                                      num_j * _recip(safe_den), 0.0)

    loss_ref[...] = main + adv_scale * adv_sum       # single (1, 1) store


# --------------------------- one-time param prep -----------------------------

def prepare_cfair_params(params, reweight_target, reweight_attrs, num_classes):
    """One-time packing; keeps the per-call pallas_call input count at ~10.

    Builds: encoder weights as-is; ONE lane-concatenated first-layer weight shared
    by the classifier and all C discriminators; block-diagonal weights for every
    remaining discriminator layer; a single (1, sum_out) bias row with static
    (offset, width) slices; a single (1, C + C*num_groups) reweight row.
    """
    f32 = jnp.float32
    enc = params["encoder"]
    cls = params["classifier"]
    discs = params["discriminators"]
    n_enc, n_cls, n_adv = len(enc), len(cls), len(discs[0])
    num_groups = discs[0][-1][0].shape[1]

    weights, bias_rows, bias_slices = [], [], []
    off = 0

    def add_bias(row):
        nonlocal off
        w = row.shape[1]
        bias_rows.append(row.astype(f32))
        bias_slices.append((off, w))
        off += w

    # encoder layers
    for w, b in enc:
        weights.append(w.astype(f32))
        add_bias(b)

    # fused first layer: classifier L0 + all discriminator L0 (lane concat)
    cls_w0, cls_b0 = cls[0]
    weights.append(jnp.concatenate(
        [cls_w0] + [discs[j][0][0] for j in range(num_classes)],
        axis=1).astype(f32))
    add_bias(jnp.concatenate(
        [cls_b0] + [discs[j][0][1] for j in range(num_classes)], axis=1))

    # classifier remaining layers
    for l in range(1, n_cls):
        w, b = cls[l]
        weights.append(w.astype(f32))
        add_bias(b)

    # discriminator remaining layers: block-diagonal per layer
    for l in range(1, n_adv):
        weights.append(jax.scipy.linalg.block_diag(
            *[discs[j][l][0] for j in range(num_classes)]).astype(f32))
        add_bias(jnp.concatenate(
            [discs[j][l][1] for j in range(num_classes)], axis=1))

    packed = dict(
        weights=tuple(weights),
        bias_pack=jnp.concatenate(bias_rows, axis=1),               # (1, sum_out)
        rw_packed=jnp.concatenate(
            [jnp.reshape(reweight_target, (1, num_classes)).astype(f32)]
            + [jnp.reshape(reweight_attrs[j], (1, num_groups)).astype(f32)
               for j in range(num_classes)], axis=1),               # (1, C+C*NG)
    )
    meta = dict(n_enc=n_enc, n_cls=n_cls, n_adv=n_adv,
                num_classes=num_classes, num_groups=num_groups,
                cls_w0_out=cls_w0.shape[1], bias_slices=tuple(bias_slices))
    return packed, meta


# ------------------------------ forward wrapper ------------------------------

def cfair_forward(packed, meta, inputs, labels, attrs, adv_coeff):
    """Fused forward: one pallas_call → (pre_softmax, {'main_cost': scalar})."""
    B = inputs.shape[0]
    num_classes = meta["num_classes"]
    la = jnp.stack([labels.astype(jnp.int32), attrs.astype(jnp.int32)], axis=1)
    flat = [inputs.astype(jnp.float32), la,
            packed["rw_packed"], packed["bias_pack"], *packed["weights"]]

    kernel = functools.partial(
        _cfair_fwd_kernel,
        adv_scale=float(adv_coeff) / float(num_classes),   # 1/C folded in
        **meta)

    pre_softmax, loss = pl.pallas_call(
        kernel,
        out_shape=(jax.ShapeDtypeStruct((B, num_classes), jnp.float32),
                   jax.ShapeDtypeStruct((1, 1), jnp.float32)),
        in_specs=[pl.BlockSpec(memory_space=pltpu.MemorySpace.VMEM)] * len(flat),
        out_specs=(pl.BlockSpec(memory_space=pltpu.MemorySpace.VMEM),
                   pl.BlockSpec(memory_space=pltpu.MemorySpace.VMEM)),
    )(*flat)

    return pre_softmax, {"main_cost": loss[0, 0]}


# ------------------------------ model params --------------------------------

def init_mlp(key, neurons):
    """nn.Linear default init: U(-1/sqrt(fan_in), ...); biases stored (1, out)."""
    layers = []
    for i in range(len(neurons) - 1):
        fan_in, fan_out = neurons[i], neurons[i + 1]
        k = 1.0 / float(fan_in) ** 0.5
        kw, kb = jax.random.split(jax.random.fold_in(key, i))
        w = jax.random.uniform(kw, (fan_in, fan_out), jnp.float32, -k, k)
        b = jax.random.uniform(kb, (1, fan_out), jnp.float32, -k, k)
        layers.append((w, b))
    return layers


# --------------------------- pure-JAX reference -----------------------------

def _ref_mlp(x, layers):
    h = x
    n = len(layers)
    for i, (w, b) in enumerate(layers):
        h = h @ w + b
        if i < n - 1:
            h = jnp.maximum(h, 0.0)
    return h


def _ref_wnll(logits, labels, mask, weight):
    logp = jax.nn.log_softmax(logits, axis=1)
    picked_logp = jnp.take_along_axis(logp, labels[:, None], axis=1)[:, 0]
    picked_w = weight[labels]
    num = jnp.sum(mask * picked_w * (-picked_logp))
    den = jnp.sum(mask * picked_w)
    return num / den


def _ref_forward(params, inputs, labels, attrs, reweight_target,
                 reweight_attrs, adv_coeff, num_classes):
    h = _ref_mlp(inputs, params["encoder"])
    pre = _ref_mlp(h, params["classifier"])
    main = _ref_wnll(pre, labels, jnp.ones((inputs.shape[0],)), reweight_target)
    advs = []
    for j in range(num_classes):
        mask = (labels == j).astype(jnp.float32)
        dl = _ref_mlp(h, params["discriminators"][j])
        advs.append(_ref_wnll(dl, attrs, mask, reweight_attrs[j]))
    return pre, main + adv_coeff * jnp.mean(jnp.stack(advs))


# ---------------------------------- main ------------------------------------

if __name__ == "__main__":
    # "args" for CFairNet (small, synthetic).
    input_dim = 16
    edepth, ewidths, zdim = 2, 32, 8
    cdepth, cwidths, num_classes = 1, 16, 2
    adepth, awidths, num_groups = 1, 16, 2
    adv_coeff = 0.5
    batch = 8

    key = jax.random.PRNGKey(0)
    k_enc, k_cls, k_disc, k_x = jax.random.split(key, 4)

    enc_neurons = [input_dim] + edepth * [ewidths] + [zdim]
    cls_neurons = [zdim] + cdepth * [cwidths] + [num_classes]
    adv_neurons = [zdim] + adepth * [awidths] + [num_groups]

    params = {
        "encoder": init_mlp(k_enc, enc_neurons),
        "classifier": init_mlp(k_cls, cls_neurons),
        "discriminators": [
            init_mlp(jax.random.fold_in(k_disc, j), adv_neurons)
            for j in range(num_classes)
        ],
    }

    x = jax.random.normal(k_x, (batch, input_dim), jnp.float32)
    labels = jnp.array([0, 1, 0, 1, 0, 1, 0, 1], jnp.int32)   # every class present
    attrs = jnp.array([0, 0, 1, 1, 0, 1, 1, 0], jnp.int32)
    reweight_target = jnp.array([1.0, 2.0], jnp.float32)                  # (C,)
    reweight_attrs = [jnp.array([1.0, 1.5], jnp.float32),                 # per class j
                      jnp.array([0.5, 2.0], jnp.float32)]

    # One-time parameter packing (stack/cast/block-diag out of the hot path).
    packed, meta = prepare_cfair_params(params, reweight_target,
                                        reweight_attrs, num_classes)

    fwd = jax.jit(lambda xi, yi, ai: cfair_forward(packed, meta, xi, yi, ai,
                                                   adv_coeff))
    pre_softmax, cost_dict = fwd(x, labels, attrs)
    pre_softmax = jax.block_until_ready(pre_softmax)
    main_cost = jax.block_until_ready(cost_dict["main_cost"])

    ref_pre, ref_cost = _ref_forward(
        params, x, labels, attrs, reweight_target, reweight_attrs,
        adv_coeff, num_classes)

    assert pre_softmax.shape == (batch, num_classes)
    assert jnp.allclose(pre_softmax, ref_pre, atol=1e-4, rtol=1e-4)
    assert jnp.allclose(main_cost, ref_cost, atol=1e-4, rtol=1e-4)

    print("KERNEL_OK")
</pallas_src>

<mosaic_0001>
module attributes {stable_mosaic.version = 11 : i64} {
  func.func @_cfair_fwd_kernel(%arg0: memref<8x16xf32, #tpu.memory_space<vmem>>, %arg1: memref<8x2xi32, #tpu.memory_space<vmem>>, %arg2: memref<1x6xf32, #tpu.memory_space<vmem>>, %arg3: memref<1x126xf32, #tpu.memory_space<vmem>>, %arg4: memref<16x32xf32, #tpu.memory_space<vmem>>, %arg5: memref<32x32xf32, #tpu.memory_space<vmem>>, %arg6: memref<32x8xf32, #tpu.memory_space<vmem>>, %arg7: memref<8x48xf32, #tpu.memory_space<vmem>>, %arg8: memref<16x2xf32, #tpu.memory_space<vmem>>, %arg9: memref<32x4xf32, #tpu.memory_space<vmem>>, %arg10: memref<8x2xf32, #tpu.memory_space<vmem>>, %arg11: memref<1x1xf32, #tpu.memory_space<vmem>>) attributes {dimension_semantics = [], scalar_prefetch = 0 : i64, scratch_operands = 0 : i64, tpu.core_type = #tpu.core_type<tc>} {
    %c0 = arith.constant 0 : index
    %c0_0 = arith.constant 0 : index
    %0 = vector.load %arg0[%c0, %c0_0] : memref<8x16xf32, #tpu.memory_space<vmem>>, vector<8x16xf32>
    %c0_1 = arith.constant 0 : index
    %c0_2 = arith.constant 0 : index
    %1 = vector.load %arg4[%c0_1, %c0_2] : memref<16x32xf32, #tpu.memory_space<vmem>>, vector<16x32xf32>
    %cst = arith.constant dense<0.000000e+00> : vector<8x32xf32>
    %2 = tpu.matmul %0, %1, %cst {dimension_numbers = #tpu.dot_dimension_numbers<[1], [0], [0], [1], [0, 0, 1, 1], [], []>} : vector<8x16xf32>, vector<16x32xf32>, vector<8x32xf32> -> vector<8x32xf32>
    %c0_3 = arith.constant 0 : index
    %c0_4 = arith.constant 0 : index
    %3 = vector.load %arg3[%c0_3, %c0_4] : memref<1x126xf32, #tpu.memory_space<vmem>>, vector<1x32xf32>
    %4 = vector.broadcast %3 : vector<1x32xf32> to vector<8x32xf32>
    %5 = arith.addf %2, %4 : vector<8x32xf32>
    %cst_5 = arith.constant 0.000000e+00 : f32
    %6 = vector.broadcast %cst_5 : f32 to vector<8x32xf32>
    %7 = arith.maximumf %5, %6 : vector<8x32xf32>
    %c0_6 = arith.constant 0 : index
    %c0_7 = arith.constant 0 : index
    %8 = vector.load %arg5[%c0_6, %c0_7] : memref<32x32xf32, #tpu.memory_space<vmem>>, vector<32x32xf32>
    %cst_8 = arith.constant dense<0.000000e+00> : vector<8x32xf32>
    %9 = tpu.matmul %7, %8, %cst_8 {dimension_numbers = #tpu.dot_dimension_numbers<[1], [0], [0], [1], [0, 0, 1, 1], [], []>} : vector<8x32xf32>, vector<32x32xf32>, vector<8x32xf32> -> vector<8x32xf32>
    %c0_9 = arith.constant 0 : index
    %c32 = arith.constant 32 : index
    %10 = vector.load %arg3[%c0_9, %c32] : memref<1x126xf32, #tpu.memory_space<vmem>>, vector<1x32xf32>
    %11 = vector.broadcast %10 : vector<1x32xf32> to vector<8x32xf32>
    %12 = arith.addf %9, %11 : vector<8x32xf32>
    %cst_10 = arith.constant 0.000000e+00 : f32
    %13 = vector.broadcast %cst_10 : f32 to vector<8x32xf32>
    %14 = arith.maximumf %12, %13 : vector<8x32xf32>
    %c0_11 = arith.constant 0 : index
    %c0_12 = arith.constant 0 : index
    %15 = vector.load %arg6[%c0_11, %c0_12] : memref<32x8xf32, #tpu.memory_space<vmem>>, vector<32x8xf32>
    %cst_13 = arith.constant dense<0.000000e+00> : vector<8x8xf32>
    %16 = tpu.matmul %14, %15, %cst_13 {dimension_numbers = #tpu.dot_dimension_numbers<[1], [0], [0], [1], [0, 0, 1, 1], [], []>} : vector<8x32xf32>, vector<32x8xf32>, vector<8x8xf32> -> vector<8x8xf32>
    %c0_14 = arith.constant 0 : index
    %c64 = arith.constant 64 : index
    %17 = vector.load %arg3[%c0_14, %c64] : memref<1x126xf32, #tpu.memory_space<vmem>>, vector<1x8xf32>
    %18 = vector.broadcast %17 : vector<1x8xf32> to vector<8x8xf32>
    %19 = arith.addf %16, %18 : vector<8x8xf32>
    %c0_15 = arith.constant 0 : index
    %c0_16 = arith.constant 0 : index
    %20 = vector.load %arg7[%c0_15, %c0_16] : memref<8x48xf32, #tpu.memory_space<vmem>>, vector<8x48xf32>
    %cst_17 = arith.constant dense<0.000000e+00> : vector<8x48xf32>
    %21 = tpu.matmul %19, %20, %cst_17 {dimension_numbers = #tpu.dot_dimension_numbers<[1], [0], [0], [1], [0, 0, 1, 1], [], []>} : vector<8x8xf32>, vector<8x48xf32>, vector<8x48xf32> -> vector<8x48xf32>
    %c0_18 = arith.constant 0 : index
    %c72 = arith.constant 72 : index
    %22 = vector.load %arg3[%c0_18, %c72] : memref<1x126xf32, #tpu.memory_space<vmem>>, vector<1x48xf32>
    %23 = vector.broadcast %22 : vector<1x48xf32> to vector<8x48xf32>
    %24 = arith.addf %21, %23 : vector<8x48xf32>
    %25 = vector.extract_strided_slice %24 {offsets = [0, 0], sizes = [8, 16], strides = [1, 1]} : vector<8x48xf32> to vector<8x16xf32>
    %26 = vector.extract_strided_slice %24 {offsets = [0, 16], sizes = [8, 32], strides = [1, 1]} : vector<8x48xf32> to vector<8x32xf32>
    %cst_19 = arith.constant 0.000000e+00 : f32
    %27 = vector.broadcast %cst_19 : f32 to vector<8x16xf32>
    %28 = arith.maximumf %25, %27 : vector<8x16xf32>
    %cst_20 = arith.constant 0.000000e+00 : f32
    %29 = vector.broadcast %cst_20 : f32 to vector<8x32xf32>
    %30 = arith.maximumf %26, %29 : vector<8x32xf32>
    %c0_21 = arith.constant 0 : index
    %c0_22 = arith.constant 0 : index
    %31 = vector.load %arg8[%c0_21, %c0_22] : memref<16x2xf32, #tpu.memory_space<vmem>>, vector<16x2xf32>
    %cst_23 = arith.constant dense<0.000000e+00> : vector<8x2xf32>
    %32 = tpu.matmul %28, %31, %cst_23 {dimension_numbers = #tpu.dot_dimension_numbers<[1], [0], [0], [1], [0, 0, 1, 1], [], []>} : vector<8x16xf32>, vector<16x2xf32>, vector<8x2xf32> -> vector<8x2xf32>
    %c0_24 = arith.constant 0 : index
    %c120 = arith.constant 120 : index
    %33 = vector.load %arg3[%c0_24, %c120] : memref<1x126xf32, #tpu.memory_space<vmem>>, vector<1x2xf32>
    %34 = vector.broadcast %33 : vector<1x2xf32> to vector<8x2xf32>
    %35 = arith.addf %32, %34 : vector<8x2xf32>
    %c0_25 = arith.constant 0 : index
    %c0_26 = arith.constant 0 : index
    %36 = vector.load %arg10[%c0_25, %c0_26] : memref<8x2xf32, #tpu.memory_space<vmem>>, vector<8x2xf32>
    tpu.vector_store %arg10[%c0_25, %c0_26], %35 {strides = array<i32>} : memref<8x2xf32, #tpu.memory_space<vmem>>, vector<8x2xf32>,
    %c0_27 = arith.constant 0 : index
    %c0_28 = arith.constant 0 : index
    %37 = vector.load %arg9[%c0_27, %c0_28] : memref<32x4xf32, #tpu.memory_space<vmem>>, vector<32x4xf32>
    %cst_29 = arith.constant dense<0.000000e+00> : vector<8x4xf32>
    %38 = tpu.matmul %30, %37, %cst_29 {dimension_numbers = #tpu.dot_dimension_numbers<[1], [0], [0], [1], [0, 0, 1, 1], [], []>} : vector<8x32xf32>, vector<32x4xf32>, vector<8x4xf32> -> vector<8x4xf32>
    %c0_30 = arith.constant 0 : index
    %c122 = arith.constant 122 : index
    %39 = vector.load %arg3[%c0_30, %c122] : memref<1x126xf32, #tpu.memory_space<vmem>>, vector<1x4xf32>
    %40 = vector.broadcast %39 : vector<1x4xf32> to vector<8x4xf32>
    %41 = arith.addf %38, %40 : vector<8x4xf32>
    %c0_31 = arith.constant 0 : index
    %c0_32 = arith.constant 0 : index
    %42 = vector.load %arg1[%c0_31, %c0_32] : memref<8x2xi32, #tpu.memory_space<vmem>>, vector<8x1xi32>
    %c0_33 = arith.constant 0 : index
    %c1 = arith.constant 1 : index
    %43 = vector.load %arg1[%c0_33, %c1] : memref<8x2xi32, #tpu.memory_space<vmem>>, vector<8x1xi32>
    %44 = tpu.iota {dimensions = array<i32: 1>} : vector<8x2xi32>
    %45 = vector.broadcast %42 : vector<8x1xi32> to vector<8x2xi32>
    %46 = arith.cmpi eq, %44, %45 : vector<8x2xi32>
    %47 = arith.extui %46 : vector<8x2xi1> to vector<8x2xi32>
    %48 = arith.sitofp %47 : vector<8x2xi32> to vector<8x2xf32>
    %49 = tpu.iota {dimensions = array<i32: 1>} : vector<8x2xi32>
    %50 = vector.broadcast %43 : vector<8x1xi32> to vector<8x2xi32>
    %51 = arith.cmpi eq, %49, %50 : vector<8x2xi32>
    %52 = arith.extui %51 : vector<8x2xi1> to vector<8x2xi32>
    %53 = arith.sitofp %52 : vector<8x2xi32> to vector<8x2xf32>
    %c0_34 = arith.constant 0 : index
    %c0_35 = arith.constant 0 : index
    %54 = vector.load %arg2[%c0_34, %c0_35] : memref<1x6xf32, #tpu.memory_space<vmem>>, vector<1x2xf32>
    %cst_36 = arith.constant dense<0xFF800000> : vector<8xf32>
    %55 = vector.multi_reduction <maximumf>, %35, %cst_36 [1] : vector<8x2xf32> to vector<8xf32>
    %56 = vector.shape_cast %55 : vector<8xf32> to vector<8x1xf32>
    %57 = vector.broadcast %56 : vector<8x1xf32> to vector<8x2xf32>
    %58 = arith.subf %35, %57 : vector<8x2xf32>
    %59 = math.exp %58 : vector<8x2xf32>
    %cst_37 = arith.constant dense<0.000000e+00> : vector<8xf32>
    %60 = vector.multi_reduction <add>, %59, %cst_37 [1] : vector<8x2xf32> to vector<8xf32>
    %61 = vector.shape_cast %60 : vector<8xf32> to vector<8x1xf32>
    %62 = math.log %61 : vector<8x1xf32>
    %63 = arith.addf %56, %62 : vector<8x1xf32>
    %64 = vector.broadcast %63 : vector<8x1xf32> to vector<8x2xf32>
    %65 = arith.subf %35, %64 : vector<8x2xf32>
    %66 = arith.mulf %65, %48 : vector<8x2xf32>
    %cst_38 = arith.constant dense<0.000000e+00> : vector<8xf32>
    %67 = vector.multi_reduction <add>, %66, %cst_38 [1] : vector<8x2xf32> to vector<8xf32>
    %68 = vector.shape_cast %67 : vector<8xf32> to vector<8x1xf32>
    %69 = vector.broadcast %54 : vector<1x2xf32> to vector<8x2xf32>
    %70 = arith.mulf %69, %48 : vector<8x2xf32>
    %cst_39 = arith.constant dense<0.000000e+00> : vector<8xf32>
    %71 = vector.multi_reduction <add>, %70, %cst_39 [1] : vector<8x2xf32> to vector<8xf32>
    %72 = vector.shape_cast %71 : vector<8xf32> to vector<8x1xf32>
    %cst_40 = arith.constant 0.000000e+00 : f32
    %73 = vector.broadcast %cst_40 : f32 to vector<8x1xf32>
    %74 = arith.subf %73, %68 : vector<8x1xf32>
    %75 = arith.mulf %72, %74 : vector<8x1xf32>
    %76 = vector.shape_cast %75 : vector<8x1xf32> to vector<1x8x1xf32>
    %cst_41 = arith.constant dense<0.000000e+00> : vector<1xf32>
    %77 = vector.multi_reduction <add>, %76, %cst_41 [1, 2] : vector<1x8x1xf32> to vector<1xf32>
    %78 = vector.shape_cast %77 : vector<1xf32> to vector<1x1x1xf32>
    %79 = vector.extract %78[0, 0, 0] : f32 from vector<1x1x1xf32>
    %80 = vector.broadcast %79 : f32 to vector<1x1xf32>
    %81 = vector.shape_cast %72 : vector<8x1xf32> to vector<1x8x1xf32>
    %cst_42 = arith.constant dense<0.000000e+00> : vector<1xf32>
    %82 = vector.multi_reduction <add>, %81, %cst_42 [1, 2] : vector<1x8x1xf32> to vector<1xf32>
    %83 = vector.shape_cast %82 : vector<1xf32> to vector<1x1x1xf32>
    %84 = vector.extract %83[0, 0, 0] : f32 from vector<1x1x1xf32>
    %85 = vector.broadcast %84 : f32 to vector<1x1xf32>
    %86 = tpu.reciprocal %85 {approx = true} : vector<1x1xf32> -> vector<1x1xf32>
    %87 = arith.mulf %85, %86 : vector<1x1xf32>
    %cst_43 = arith.constant 2.000000e+00 : f32
    %88 = vector.broadcast %cst_43 : f32 to vector<1x1xf32>
    %89 = arith.subf %88, %87 : vector<1x1xf32>
    %90 = arith.mulf %86, %89 : vector<1x1xf32>
    %91 = arith.mulf %80, %90 : vector<1x1xf32>
    %cst_44 = arith.constant 0.000000e+00 : f32
    %92 = vector.broadcast %cst_44 : f32 to vector<1x1xf32>
    %93 = vector.extract_strided_slice %41 {offsets = [0, 0], sizes = [8, 2], strides = [1, 1]} : vector<8x4xf32> to vector<8x2xf32>
    %cst_45 = arith.constant dense<0xFF800000> : vector<8xf32>
    %94 = vector.multi_reduction <maximumf>, %93, %cst_45 [1] : vector<8x2xf32> to vector<8xf32>
    %95 = vector.shape_cast %94 : vector<8xf32> to vector<8x1xf32>
    %96 = vector.broadcast %95 : vector<8x1xf32> to vector<8x2xf32>
    %97 = arith.subf %93, %96 : vector<8x2xf32>
    %98 = math.exp %97 : vector<8x2xf32>
    %cst_46 = arith.constant dense<0.000000e+00> : vector<8xf32>
    %99 = vector.multi_reduction <add>, %98, %cst_46 [1] : vector<8x2xf32> to vector<8xf32>
    %100 = vector.shape_cast %99 : vector<8xf32> to vector<8x1xf32>
    %101 = math.log %100 : vector<8x1xf32>
    %102 = arith.addf %95, %101 : vector<8x1xf32>
    %103 = vector.broadcast %102 : vector<8x1xf32> to vector<8x2xf32>
    %104 = arith.subf %93, %103 : vector<8x2xf32>
    %c0_47 = arith.constant 0 : index
    %c2 = arith.constant 2 : index
    %105 = vector.load %arg2[%c0_47, %c2] : memref<1x6xf32, #tpu.memory_space<vmem>>, vector<1x2xf32>
    %106 = arith.mulf %104, %53 : vector<8x2xf32>
    %cst_48 = arith.constant dense<0.000000e+00> : vector<8xf32>
    %107 = vector.multi_reduction <add>, %106, %cst_48 [1] : vector<8x2xf32> to vector<8xf32>
    %108 = vector.shape_cast %107 : vector<8xf32> to vector<8x1xf32>
    %109 = vector.broadcast %105 : vector<1x2xf32> to vector<8x2xf32>
    %110 = arith.mulf %109, %53 : vector<8x2xf32>
    %cst_49 = arith.constant dense<0.000000e+00> : vector<8xf32>
    %111 = vector.multi_reduction <add>, %110, %cst_49 [1] : vector<8x2xf32> to vector<8xf32>
    %112 = vector.shape_cast %111 : vector<8xf32> to vector<8x1xf32>
    %113 = vector.extract_strided_slice %48 {offsets = [0, 0], sizes = [8, 1], strides = [1, 1]} : vector<8x2xf32> to vector<8x1xf32>
    %114 = arith.mulf %113, %112 : vector<8x1xf32>
    %cst_50 = arith.constant 0.000000e+00 : f32
    %115 = vector.broadcast %cst_50 : f32 to vector<8x1xf32>
    %116 = arith.subf %115, %108 : vector<8x1xf32>
    %117 = arith.mulf %114, %116 : vector<8x1xf32>
    %118 = vector.shape_cast %117 : vector<8x1xf32> to vector<1x8x1xf32>
    %cst_51 = arith.constant dense<0.000000e+00> : vector<1xf32>
    %119 = vector.multi_reduction <add>, %118, %cst_51 [1, 2] : vector<1x8x1xf32> to vector<1xf32>
    %120 = vector.shape_cast %119 : vector<1xf32> to vector<1x1x1xf32>
    %121 = vector.extract %120[0, 0, 0] : f32 from vector<1x1x1xf32>
    %122 = vector.broadcast %121 : f32 to vector<1x1xf32>
    %123 = arith.mulf %113, %112 : vector<8x1xf32>
    %124 = vector.shape_cast %123 : vector<8x1xf32> to vector<1x8x1xf32>
    %cst_52 = arith.constant dense<0.000000e+00> : vector<1xf32>
    %125 = vector.multi_reduction <add>, %124, %cst_52 [1, 2] : vector<1x8x1xf32> to vector<1xf32>
    %126 = vector.shape_cast %125 : vector<1xf32> to vector<1x1x1xf32>
    %127 = vector.extract %126[0, 0, 0] : f32 from vector<1x1x1xf32>
    %128 = vector.broadcast %127 : f32 to vector<1x1xf32>
    %cst_53 = arith.constant 0.000000e+00 : f32
    %129 = vector.broadcast %cst_53 : f32 to vector<1x1xf32>
    %130 = arith.cmpf ogt, %128, %129 : vector<1x1xf32>
    %cst_54 = arith.constant 1.000000e+00 : f32
    %131 = vector.broadcast %cst_54 : f32 to vector<1x1xf32>
    %132 = arith.select %130, %128, %131 : vector<1x1xi1>, vector<1x1xf32>
    %cst_55 = arith.constant 0.000000e+00 : f32
    %133 = vector.broadcast %cst_55 : f32 to vector<1x1xf32>
    %134 = arith.cmpf ogt, %128, %133 : vector<1x1xf32>
    %135 = tpu.reciprocal %132 {approx = true} : vector<1x1xf32> -> vector<1x1xf32>
    %136 = arith.mulf %132, %135 : vector<1x1xf32>
    %cst_56 = arith.constant 2.000000e+00 : f32
    %137 = vector.broadcast %cst_56 : f32 to vector<1x1xf32>
    %138 = arith.subf %137, %136 : vector<1x1xf32>
    %139 = arith.mulf %135, %138 : vector<1x1xf32>
    %140 = arith.mulf %122, %139 : vector<1x1xf32>
    %cst_57 = arith.constant 0.000000e+00 : f32
    %141 = vector.broadcast %cst_57 : f32 to vector<1x1xf32>
    %142 = arith.select %134, %140, %141 : vector<1x1xi1>, vector<1x1xf32>
    %143 = arith.addf %92, %142 : vector<1x1xf32>
    %144 = vector.extract_strided_slice %41 {offsets = [0, 2], sizes = [8, 2], strides = [1, 1]} : vector<8x4xf32> to vector<8x2xf32>
    %cst_58 = arith.constant dense<0xFF800000> : vector<8xf32>
    %145 = vector.multi_reduction <maximumf>, %144, %cst_58 [1] : vector<8x2xf32> to vector<8xf32>
    %146 = vector.shape_cast %145 : vector<8xf32> to vector<8x1xf32>
    %147 = vector.broadcast %146 : vector<8x1xf32> to vector<8x2xf32>
    %148 = arith.subf %144, %147 : vector<8x2xf32>
    %149 = math.exp %148 : vector<8x2xf32>
    %cst_59 = arith.constant dense<0.000000e+00> : vector<8xf32>
    %150 = vector.multi_reduction <add>, %149, %cst_59 [1] : vector<8x2xf32> to vector<8xf32>
    %151 = vector.shape_cast %150 : vector<8xf32> to vector<8x1xf32>
    %152 = math.log %151 : vector<8x1xf32>
    %153 = arith.addf %146, %152 : vector<8x1xf32>
    %154 = vector.broadcast %153 : vector<8x1xf32> to vector<8x2xf32>
    %155 = arith.subf %144, %154 : vector<8x2xf32>
    %c0_60 = arith.constant 0 : index
    %c4 = arith.constant 4 : index
    %156 = vector.load %arg2[%c0_60, %c4] : memref<1x6xf32, #tpu.memory_space<vmem>>, vector<1x2xf32>
    %157 = arith.mulf %155, %53 : vector<8x2xf32>
    %cst_61 = arith.constant dense<0.000000e+00> : vector<8xf32>
    %158 = vector.multi_reduction <add>, %157, %cst_61 [1] : vector<8x2xf32> to vector<8xf32>
    %159 = vector.shape_cast %158 : vector<8xf32> to vector<8x1xf32>
    %160 = vector.broadcast %156 : vector<1x2xf32> to vector<8x2xf32>
    %161 = arith.mulf %160, %53 : vector<8x2xf32>
    %cst_62 = arith.constant dense<0.000000e+00> : vector<8xf32>
    %162 = vector.multi_reduction <add>, %161, %cst_62 [1] : vector<8x2xf32> to vector<8xf32>
    %163 = vector.shape_cast %162 : vector<8xf32> to vector<8x1xf32>
    %164 = vector.extract_strided_slice %48 {offsets = [0, 1], sizes = [8, 1], strides = [1, 1]} : vector<8x2xf32> to vector<8x1xf32>
    %165 = arith.mulf %164, %163 : vector<8x1xf32>
    %cst_63 = arith.constant 0.000000e+00 : f32
    %166 = vector.broadcast %cst_63 : f32 to vector<8x1xf32>
    %167 = arith.subf %166, %159 : vector<8x1xf32>
    %168 = arith.mulf %165, %167 : vector<8x1xf32>
    %169 = vector.shape_cast %168 : vector<8x1xf32> to vector<1x8x1xf32>
    %cst_64 = arith.constant dense<0.000000e+00> : vector<1xf32>
    %170 = vector.multi_reduction <add>, %169, %cst_64 [1, 2] : vector<1x8x1xf32> to vector<1xf32>
    %171 = vector.shape_cast %170 : vector<1xf32> to vector<1x1x1xf32>
    %172 = vector.extract %171[0, 0, 0] : f32 from vector<1x1x1xf32>
    %173 = vector.broadcast %172 : f32 to vector<1x1xf32>
    %174 = arith.mulf %164, %163 : vector<8x1xf32>
    %175 = vector.shape_cast %174 : vector<8x1xf32> to vector<1x8x1xf32>
    %cst_65 = arith.constant dense<0.000000e+00> : vector<1xf32>
    %176 = vector.multi_reduction <add>, %175, %cst_65 [1, 2] : vector<1x8x1xf32> to vector<1xf32>
    %177 = vector.shape_cast %176 : vector<1xf32> to vector<1x1x1xf32>
    %178 = vector.extract %177[0, 0, 0] : f32 from vector<1x1x1xf32>
    %179 = vector.broadcast %178 : f32 to vector<1x1xf32>
    %cst_66 = arith.constant 0.000000e+00 : f32
    %180 = vector.broadcast %cst_66 : f32 to vector<1x1xf32>
    %181 = arith.cmpf ogt, %179, %180 : vector<1x1xf32>
    %cst_67 = arith.constant 1.000000e+00 : f32
    %182 = vector.broadcast %cst_67 : f32 to vector<1x1xf32>
    %183 = arith.select %181, %179, %182 : vector<1x1xi1>, vector<1x1xf32>
    %cst_68 = arith.constant 0.000000e+00 : f32
    %184 = vector.broadcast %cst_68 : f32 to vector<1x1xf32>
    %185 = arith.cmpf ogt, %179, %184 : vector<1x1xf32>
    %186 = tpu.reciprocal %183 {approx = true} : vector<1x1xf32> -> vector<1x1xf32>
    %187 = arith.mulf %183, %186 : vector<1x1xf32>
    %cst_69 = arith.constant 2.000000e+00 : f32
    %188 = vector.broadcast %cst_69 : f32 to vector<1x1xf32>
    %189 = arith.subf %188, %187 : vector<1x1xf32>
    %190 = arith.mulf %186, %189 : vector<1x1xf32>
    %191 = arith.mulf %173, %190 : vector<1x1xf32>
    %cst_70 = arith.constant 0.000000e+00 : f32
    %192 = vector.broadcast %cst_70 : f32 to vector<1x1xf32>
    %193 = arith.select %185, %191, %192 : vector<1x1xi1>, vector<1x1xf32>
    %194 = arith.addf %143, %193 : vector<1x1xf32>
    %cst_71 = arith.constant 2.500000e-01 : f32
    %195 = vector.broadcast %cst_71 : f32 to vector<1x1xf32>
    %196 = arith.mulf %195, %194 : vector<1x1xf32>
    %197 = arith.addf %91, %196 : vector<1x1xf32>
    %c0_72 = arith.constant 0 : index
    %c0_73 = arith.constant 0 : index
    %198 = vector.load %arg11[%c0_72, %c0_73] : memref<1x1xf32, #tpu.memory_space<vmem>>, vector<1x1xf32>
    tpu.vector_store %arg11[%c0_72, %c0_73], %197 {strides = array<i32>} : memref<1x1xf32, #tpu.memory_space<vmem>>, vector<1x1xf32>,
    return
  }
}

</mosaic_0001>

<bundles_post_ra>
// kernel: _lambda_.1
= control target key start
LH: loop header
LB: loop body
LE: loop exit
PB: predicated region body
PF: predicated region fallthrough
CT: control target
= control target key end

     0   :  { %17 = vsyncpa [#allocation3], 0  ;;  %s1381_s0 = inlined_call_operand.hbm [shape: f32[8,16], index: 0, kind: input, shape index: {}]   ;;  %s1382_s1 = inlined_call_operand.vmem [shape: s32[8,2], index: 1, kind: input, shape index: {}]   ;;  %s1383_s2 = inlined_call_operand.vmem [shape: f32[1,6], index: 2, kind: input, shape index: {}]   ;;  %s1384_s3 = inlined_call_operand.vmem [shape: f32[1,126], index: 3, kind: input, shape index: {}]   ;;  %s1385_s4 = inlined_call_operand.hbm [shape: f32[16,32], index: 4, kind: input, shape index: {}]   ;;  %s1386_s5 = inlined_call_operand.hbm [shape: f32[32,32], index: 5, kind: input, shape index: {}]   ;;  %s1387_s6 = inlined_call_operand.hbm [shape: f32[32,8], index: 6, kind: input, shape index: {}]   ;;  %s1388_s7 = inlined_call_operand.hbm [shape: f32[8,48], index: 7, kind: input, shape index: {}]   ;;  %s1389_s8 = inlined_call_operand.hbm [shape: f32[16,2], index: 8, kind: input, shape index: {}]   ;;  %s1390_s9 = inlined_call_operand.vmem [shape: f32[32,4], index: 9, kind: input, shape index: {}]   ;;  %s1391_s10 = inlined_call_operand.vmem [shape: f32[8,2], index: 10, kind: output, shape index: {0}]   ;;  %s1392_s11 = inlined_call_operand.hbm [shape: f32[1,1], index: 11, kind: output, shape index: {1}]  }
   0x1   :  { %18 = vsyncpa [#allocation6], 0 }
   0x2   :  { %19 = vsyncpa [#allocation9], 0 }
   0x3   :  { %20 = vsyncpa [#allocation12], 0 }
   0x4   :  { %21 = vsyncpa [#allocation4], 0  ;;  %s1142_s17 = smov [#allocation5]  }
   0x5   :  { %s43_s18 = sshll.u32 %s1142_s17, 4  ;;  %s44_s18 = int_to_ptr.vmem [resolvable:$true] %s43_s18 }
   0x6   :  { %s1000_s19 = scalar_lea.vmem %s44_s18, 256  ;;  %p1005_p1 = scmp.lt.s32.totalorder %s44_s18, %s44_s18 }
   0x7   :  { %p1001_p0 = scmp.ne.s32.totalorder %s44_s18, %s1000_s19  ;;  %p1006_p2 = scmp.lt.s32.totalorder %s1000_s19, %s1000_s19 }
   0x9   :  { %p1007_p3 = por %p1006_p2, %p1005_p1 }
   0xb   :  { %p1008_p4 = pnand %p1007_p3, %p1001_p0 }
   0xd   :  { %1011 = shalt.err (!%p1008_p4)
}
   0xe   :  { %s1143_s20 = smov 128   ;;  %s1144_s21 = smov 8  }
   0xf   :  { %49 = dma.hbm_to_vmem [thread:$0]  %s1385_s4, 256, %s44_s18, [#allocation6], %s1143_s20, %s1143_s20, %s1144_s21  }
  0x10   :  { %s1145_s24 = smov [#allocation8]   ;;  %s1146_s26 = smov [#allocation2]  }
  0x11   :  { %s67_s25 = sshll.u32 %s1145_s24, 4  ;;  %s28_s27 = sshll.u32 %s1146_s26, 4  ;;  %s68_s25 = int_to_ptr.vmem [resolvable:$true] %s67_s25  ;;  %s29_s27 = int_to_ptr.vmem [resolvable:$true] %s28_s27 }
  0x12   :  { %s1020_s28 = scalar_lea.vmem %s68_s25, 512  ;;  %p1025_p6 = scmp.lt.s32.totalorder %s68_s25, %s68_s25 }
  0x13   :  { %p1021_p5 = scmp.ne.s32.totalorder %s68_s25, %s1020_s28  ;;  %p1026_p7 = scmp.lt.s32.totalorder %s1020_s28, %s1020_s28 }
  0x15   :  { %p1027_p8 = por %p1026_p7, %p1025_p6 }
  0x17   :  { %p1028_p9 = pnand %p1027_p8, %p1021_p5 }
  0x19   :  { %1031 = shalt.err (!%p1028_p9)
}
  0x1a   :  { %73 = dma.hbm_to_vmem [thread:$0]  %s1387_s6, 512, %s68_s25, [#allocation9], %s1143_s20, %s1143_s20, %s1144_s21  }
  0x1b   :  { %s1040_s4 = scalar_lea.vmem %s29_s27, 128  ;;  %p1045_p11 = scmp.lt.s32.totalorder %s29_s27, %s29_s27 }
  0x1c   :  { %p1041_p10 = scmp.ne.s32.totalorder %s29_s27, %s1040_s4  ;;  %p1046_p12 = scmp.lt.s32.totalorder %s1040_s4, %s1040_s4 }
  0x1e   :  { %p1047_p13 = por %p1046_p12, %p1045_p11 }
  0x20   :  { %p1048_p0 = pnand %p1047_p13, %p1041_p10 }
  0x22   :  { %1051 = shalt.err (!%p1048_p0)
}
  0x23   :  { %31 = dma.hbm_to_vmem [thread:$0]  %s1381_s0, 128, %s29_s27, [#allocation3]  }
  0x24   :  { %s1147_s14 = smov [#allocation7]   ;;  %s1148_s16 = smov [#allocation10]  }
  0x25   :  { %s55_s15 = sshll.u32 %s1147_s14, 4  ;;  %s80_s17 = sshll.u32 %s1148_s16, 4  ;;  %s56_s15 = int_to_ptr.vmem [resolvable:$true] %s55_s15  ;;  %s81_s17 = int_to_ptr.vmem [resolvable:$true] %s80_s17 }
  0x26   :  { %s1060_s18 = scalar_lea.vmem %s56_s15, 512  ;;  %p1065_p2 = scmp.lt.s32.totalorder %s56_s15, %s56_s15 }
  0x27   :  { %p1061_p1 = scmp.ne.s32.totalorder %s56_s15, %s1060_s18  ;;  %p1066_p3 = scmp.lt.s32.totalorder %s1060_s18, %s1060_s18 }
  0x29   :  { %p1067_p4 = por %p1066_p3, %p1065_p2 }
  0x2b   :  { %p1068_p5 = pnand %p1067_p4, %p1061_p1 }
  0x2d   :  { %1071 = shalt.err (!%p1068_p5)
}
  0x2e   :  { %61 = dma.hbm_to_vmem [thread:$0]  %s1386_s5, 512, %s56_s15, [#allocation6], %s1143_s20, %s1143_s20, %s1144_s21  }
  0x2f   :  { %s1080_s0 = scalar_lea.vmem %s81_s17, 128  ;;  %p1085_p7 = scmp.lt.s32.totalorder %s81_s17, %s81_s17 }
  0x30   :  { %p1081_p6 = scmp.ne.s32.totalorder %s81_s17, %s1080_s0  ;;  %p1086_p8 = scmp.lt.s32.totalorder %s1080_s0, %s1080_s0 }
  0x32   :  { %p1087_p9 = por %p1086_p8, %p1085_p7 }
  0x34   :  { %p1088_p10 = pnand %p1087_p9, %p1081_p6 }
  0x36   :  { %1091 = shalt.err (!%p1088_p10)
}
  0x37   :  { %83 = dma.hbm_to_vmem [thread:$0]  %s1388_s7, 128, %s81_s17, [#allocation9]  }
  0x38   :  { %s1149_s24 = smov [#allocation11]  }
  0x39   :  { %s89_s25 = sshll.u32 %s1149_s24, 4  ;;  %s90_s25 = int_to_ptr.vmem [resolvable:$true] %s89_s25 }
  0x3a   :  { %s1100_s26 = scalar_lea.vmem %s90_s25, 256  ;;  %p1105_p12 = scmp.lt.s32.totalorder %s90_s25, %s90_s25 }
  0x3b   :  { %p1101_p11 = scmp.ne.s32.totalorder %s90_s25, %s1100_s26  ;;  %p1106_p13 = scmp.lt.s32.totalorder %s1100_s26, %s1100_s26 }
  0x3d   :  { %p1107_p0 = por %p1106_p13, %p1105_p12 }
  0x3f   :  { %p1108_p1 = pnand %p1107_p0, %p1101_p11 }
  0x41   :  { %1111 = shalt.err (!%p1108_p1)
}
  0x42   :  { %95 = dma.hbm_to_vmem [thread:$0]  %s1389_s8, 256, %s90_s25, [#allocation12], %s1143_s20, %s1143_s20, %s1144_s21  }
  0x43   :  { %1132 = dma.done.wait [#allocation3], 128  }
  0x44   :  { %1133 = vsyncadd [#allocation3], 4294967168 }
  0x45   :  { %1134 = dma.done.wait [#allocation6], 768  }
  0x46   :  { %1135 = vsyncadd [#allocation6], 4294966528 }
  0x47   :  { %1136 = dma.done.wait [#allocation9], 640  }
  0x48   :  { %1137 = vsyncadd [#allocation9], 4294966656 }
  0x49   :  { %1138 = dma.done.wait [#allocation12], 256  }
  0x4a   :  { %1139 = vsyncadd [#allocation12], 4294967040  ;;  %v1150_v0 = vmov 0.0   ;;  %vm1151_vm0 = vmmov 0   ;;  %v118_v1 = vld [vmem:[#allocation5 + $0x8] sm:$0xff]  ;;  %v117_v2 = vld [vmem:[#allocation5] sm:$0xff]  ;;  %v610_v57 = vlaneseq }
  0x4b   :  { %884 = vmatprep.subr.mxu0 %v1150_v0  ;;  %888 = vmatprep.mubr.msk.f32.mxu0 %vm1151_vm0, %v1150_v0  ;;  %v116_v3 = vld [vmem:[#allocation2] sm:$0xff]  ;;  %vm126_vm1 = vcmask 130048   ;;  %v204_v4 = vld [vmem:[#allocation7 + $0x18] sm:$0xff]  ;;  %v203_v5 = vld [vmem:[#allocation7 + $0x10] sm:$0xff]  ;;  %s1152_s20 = smov 96   ;;  %vm208_vm2 = vcmask 261120  }
  0x4c   :  { %891 = vmatprep.subr.mxu1 %v1150_v0  ;;  %899 = vmatprep.mubr.msk.f32.mxu1 %vm1151_vm0, %v1150_v0  ;;  %v202_v6 = vld [vmem:[#allocation7 + $0x8] sm:$0xff]  ;;  %v201_v7 = vld [vmem:[#allocation7] sm:$0xff]  ;;  %v286_v9 = vld [vmem:[#allocation8 + $0x18] sm:$0xff]  ;;  %s1154_s28 = smov 56   ;;  %vm367_vm3 = vcmask 64512   ;;  %s1155_s17 = smov 112  }
  0x4d   :  { %885 = vmatpush3.msra.mxu0 %v118_v1  ;;  %892 = vmatpush3.msra.mxu1 %v204_v4  ;;  %v1272_v8 = vld [vmem:[%s1384_s3] ss:$0 sm:$0xff]  ;;  %v285_v14 = vld [vmem:[#allocation8 + $0x10] sm:$0xff]  ;;  %v283_v16 = vld [vmem:[#allocation8] sm:$0xff]  ;;  %s1153_s3 = smov 64   ;;  %s1156_s18 = smov 6  }
  0x4e   :  { %886 = vmatprep.subr.mxu0 %v1150_v0  ;;  %893 = vmatprep.subr.mxu1 %v1150_v0  ;;  %v284_v15 = vld [vmem:[#allocation8 + $0x8] sm:$0xff]  ;;  %v363_v17 = vld [vmem:[#allocation10] sm:$0xff]  ;;  %v443_v27 = vld [vmem:[#allocation11 + $0x8] sm:$0xff]  ;;  %vm745_vm4 = vcmask 31760   ;;  %v1157_v46 = vmov 1   ;;  %vm520_vm5 = vcmask 15360  }
  0x4f   :  { %887 = vmatpush3.msra.mxu0 %v117_v2  ;;  %894 = vmatpush3.msra.mxu1 %v203_v5  ;;  %v442_v28 = vld [vmem:[#allocation11] sm:$0xff]  ;;  %v525_v29 = vld [vmem:[%s1390_s9 + $0x18] sm:$0xff]  ;;  %v524_v30 = vld [vmem:[%s1390_s9 + $0x10] sm:$0xff]  ;;  %v611_v59 = vand.u32 127, %v610_v57  ;;  %v1161_v62 = vmov 0   ;;  %s1162_s24 = smov 124  }
  0x50   :  { %889 = vmatmul.mubr.msk.f32.vlgmr.msra.gmra.mxu0 %vm126_vm1, %v116_v3  ;;  %902 = vmatprep.subr.mxu0 %v1150_v0  ;;  %v523_v31 = vld [vmem:[%s1390_s9 + $0x8] sm:$0xff]  ;;  %v522_v32 = vld [vmem:[%s1390_s9] sm:$0xff]  ;;  %s1158_s9 = smov 126   ;;  %vm654_vm8 = vcmask 7168   ;;  %vm826_vm11 = vcmask 0  }
  0x51   :  { %910 = vmatprep.mubr.msk.f32.mxu0 %vm1151_vm0, %v1150_v0  ;;  %895 = vmatprep.subr.mxu1 %v1150_v0  ;;  %v609_v51 = vld [vmem:[%s1382_s1] sm:$0xff]  ;;  %s1159_s1 = smov 4  }
  0x52   :  { %896 = vmatpush3.msra.mxu1 %v202_v6  ;;  %205 = vrot.lane.b32.xlu0 %v1272_v8, %s1152_s20  ;;  %v860_v1 = vld [vmem:[%s1383_s2] ss:$0 sm:$0xff]  ;;  %s1163_s2 = smov 127   ;;  %s1164_s20 = smov [#allocation13]  }
  0x53   :  { %897 = vmatprep.subr.mxu1 %v1150_v0  ;;  %903 = vmatpush3.msra.mxu0 %v286_v9 }
  0x54   :  { %898 = vmatpush3.msra.mxu1 %v201_v7  ;;  %904 = vmatprep.subr.mxu0 %v1150_v0 }
  0x55   :  { %913 = vmatprep.subr.mxu1 %v1150_v0  ;;  %905 = vmatpush3.msra.mxu0 %v285_v14 }
  0x56   :  { %906 = vmatprep.subr.mxu0 %v1150_v0  ;;  %287 = vrot.lane.b32.xlu0 %v1272_v8, %s1153_s3  ;;  %s836_s3 = sshll.u32 %s1164_s20, 4  ;;  %s837_s3 = int_to_ptr.vmem [resolvable:$true] %s836_s3 }
  0x57   :  { %907 = vmatpush3.msra.mxu0 %v284_v15  ;;  %364 = vrot.lane.b32.xlu1 %v1272_v8, %s1154_s28  ;;  %s1112_s28 = scalar_lea.vmem %s837_s3, 16  ;;  %s1116_s29 = scalar_lea.vmem %s837_s3, 32 }
  0x58   :  { %908 = vmatprep.subr.mxu0 %v1150_v0  ;;  %971 = vset.pattern.permute.xlu0 %v1157_v46  ;;  %p1113_p2 = scmp.ne.s32.totalorder %s837_s3, %s1112_s28  ;;  %p1117_p3 = scmp.lt.s32.totalorder %s837_s3, %s837_s3 }
  0x59   :  { %909 = vmatpush3.msra.mxu0 %v283_v16  ;;  %p1118_p4 = scmp.lt.s32.totalorder %s1116_s29, %s1112_s28 }
  0x5a   :  { %918 = vmatprep.subr.mxu0 %v1150_v0  ;;  %534 = vrot.lane.b32.xlu0 %v1272_v8, %s1156_s18 }
  0x5b   :  { %p1119_p5 = por %p1118_p4, %p1117_p3 }
  0x5d   :  { %p1120_p6 = pnand %p1119_p5, %p1113_p2 }
  0xc4   :  { %v206_v18 = vpop.permute.xlu0 %205 }
  0xc8   :  { %v288_v23 = vpop.permute.xlu0 %287 }
  0xc9   :  { %v365_v33 = vpop.permute.xlu1 %364 }
  0xcc   :  { %v535_v41 = vpop.permute.xlu0 %534 }
 0x110   :  { %v196_v10 = vpop.f32.mrf.mxu0 }
 0x111   :  { %v197_v11 = vadd.f32 %v1272_v8, %v196_v10 }
 0x112   :  { %v890_v12 = vpop.f32.mrf.mxu0 }
 0x113   :  { %v200_v13 = vmax.f32 %v197_v11, 0.0 }
 0x115   :  { %900 = vmatmul.mubr.msk.f32.vlgmr.msra.gmra.mxu1 %vm208_vm2, %v200_v13 }
 0x116   :  { %915 = vmatprep.mubr.msk.f32.mxu1 %vm1151_vm0, %v1150_v0  ;;  %914 = vmatpush3.msra.mxu1 %v363_v17 }
 0x117   :  { %925 = vmatprep.subr.mxu1 %v1150_v0 }
 0x1d5   :  { %v278_v19 = vpop.f32.mrf.mxu1 }
 0x1d6   :  { %v279_v20 = vadd.f32 %v278_v19, %v206_v18 }
 0x1d7   :  { %v901_v21 = vpop.f32.mrf.mxu1 }
 0x1d8   :  { %v282_v22 = vmax.f32 %v279_v20, 0.0 }
 0x1da   :  { %911 = vmatmul.mubr.msk.f32.vlgmr.msra.gmra.mxu0 %vm208_vm2, %v282_v22 }
 0x1db   :  { %922 = vmatprep.mubr.msk.f32.mxu0 %vm1151_vm0, %v1150_v0  ;;  %919 = vmatpush3.msra.mxu0 %v443_v27 }
 0x1dc   :  { %920 = vmatprep.subr.mxu0 %v1150_v0 }
 0x1dd   :  { %921 = vmatpush3.msra.mxu0 %v442_v28 }
 0x29a   :  { %v359_v24 = vpop.f32.mrf.mxu0 }
 0x29b   :  { %v360_v25 = vadd.f32 %v359_v24, %v288_v23 }
 0x29c   :  { %v912_v26 = vpop.f32.mrf.mxu0 }
 0x29d   :  { %916 = vmatmul.mubr.msk.f32.vlgmr.msra.gmra.mxu1 %vm367_vm3, %v360_v25 }
 0x29e   :  { %933 = vmatprep.mubr.msk.f32.mxu1 %vm1151_vm0, %v1150_v0  ;;  %926 = vmatpush3.msra.mxu1 %v525_v29 }
 0x29f   :  { %927 = vmatprep.subr.mxu1 %v1150_v0 }
 0x2a0   :  { %928 = vmatpush3.msra.mxu1 %v524_v30 }
 0x2a1   :  { %929 = vmatprep.subr.mxu1 %v1150_v0 }
 0x2a2   :  { %930 = vmatpush3.msra.mxu1 %v523_v31 }
 0x2a3   :  { %931 = vmatprep.subr.mxu1 %v1150_v0 }
 0x2a4   :  { %932 = vmatpush3.msra.mxu1 %v522_v32 }
 0x35d   :  { %v437_v34 = vpop.f32.mrf.mxu1 }
 0x35e   :  { %v438_v35 = vadd.f32 %v437_v34, %v365_v33 }
 0x35f   :  { %v917_v36 = vpop.f32.mrf.mxu1 }
 0x360   :  { %v441_v37 = vmax.f32 %v438_v35, 0.0 }
 0x362   :  { %532 = vrot.lane.b32.xlu1 %v441_v37, %s1155_s17  ;;  %923 = vmatmul.mubr.msk.f32.vlgmr.msra.gmra.mxu0 %vm126_vm1, %v441_v37 }
 0x3d4   :  { %v533_v38 = vpop.permute.xlu1 %532 }
 0x3d5   :  { %934 = vmatmul.mubr.msk.f32.vlgmr.msra.gmra.mxu1 %vm208_vm2, %v533_v38 }
 0x422   :  { %v516_v39 = vpop.f32.mrf.mxu0 }
 0x424   :  { %v924_v40 = vpop.f32.mrf.mxu0 }
 0x495   :  { %v605_v42 = vpop.f32.mrf.mxu1 }
 0x496   :  { %v1311_v43 = vadd.f32 %v605_v42, %v535_v41 }
 0x497   :  { %v935_v44 = vpop.f32.mrf.mxu1 }
 0x498   :  { %v746_v45 = vsel %vm745_vm4, %v1311_v43, -inf  ;;  %v682_v58 = vsel %vm520_vm5, %v1311_v43, -inf }
 0x499   :  { %747 = vmax.xlane.f32.xlu1 %v746_v45 }
 0x522   :  { %v748_v47 = vpop.xlane.xlu1 %747 }
 0x523   :  { %v749_v48 = vsub.f32 %v1311_v43, %v748_v47 }
 0x525   :  { %v750_v49 = vmul.f32 1.442695, %v749_v48 }
 0x527   :  { %974 = vpow2.f32 %v750_v49 }
 0x534   :  { %v975_v50 = vpop.eup %974 }
 0x535   :  { %753 = vrot.lane.b32.xlu0 %v975_v50, %s1158_s9 }
 0x539   :  { %444 = vrot.lane.b32.xlu0 %v1272_v8, %s1144_s21  ;;  %s1160_s21 = smov 2  }
 0x53d   :  { %619 = vperm.xlu0 %971, %v609_v51  }
 0x541   :  { %972 = vset.pattern.permute.xlu0 %v1161_v62 }
 0x5a7   :  { %v754_v52 = vpop.permute.xlu0 %753 }
 0x5a8   :  { %v756_v53 = vsel %vm520_vm5, %v754_v52, 0.0 }
 0x5a9   :  { %757 = vadd.xlane.f32.xlu0 %v756_v53 }
 0x5ab   :  { %v445_v54 = vpop.permute.xlu0 %444 }
 0x5ac   :  { %v1322_v55 = vadd.f32 %v516_v39, %v445_v54 }
 0x5ae   :  { %521 = vst.msk [vmem:[%s1391_s10] sm:$0xff] %vm520_vm5, %v1322_v55  ;;  %v625_v56 = vsel %vm520_vm5, %v1322_v55, -inf }
 0x5af   :  { %626 = vmax.xlane.f32.xlu1 %v625_v56 }
 0x5b3   :  { %683 = vmax.xlane.f32.xlu1 %v682_v58 }
 0x5b8   :  { %v620_v60 = vpop.permute.xlu0 %619 }
 0x5b9   :  { %vm621_vm6 = vcmp.eq.s32.totalorder %v611_v59, %v620_v60 }
 0x5ba   :  { %v859_v61 = vsel %vm621_vm6, 1.0, %v1150_v0 }
 0x5bf   :  { %771 = vrot.lane.b32.xlu0 %v859_v61, %s1159_s1 }
 0x5c4   :  { %700 = vrot.lane.b32.xlu1 %v859_v61, %s1160_s21 }
 0x632   :  { %v758_v63 = vpop.xlane.xlu0 %757 }
 0x633   :  { %976 = vlog2.f32 %v758_v63 }
 0x636   :  { %v772_v2 = vpop.permute.xlu0 %771 }
 0x637   :  { %v774_v3 = vmul.f32 %v860_v1, %v772_v2 }
 0x638   :  { %v627_v4 = vpop.xlane.xlu1 %626 }
 0x639   :  { %776 = vrot.lane.b32.xlu1 %v774_v3, %s1162_s24  ;;  %v628_v16 = vsub.f32 %v1322_v55, %v627_v4 }
 0x63b   :  { %v629_v17 = vmul.f32 1.442695, %v628_v16 }
 0x63c   :  { %v684_v5 = vpop.xlane.xlu1 %683 }
 0x63d   :  { %v685_v6 = vsub.f32 %v1311_v43, %v684_v5 }
 0x63f   :  { %v686_v7 = vmul.f32 1.442695, %v685_v6 }
 0x640   :  { %v977_v8 = vpop.eup %976  ;;  %v701_v12 = vpop.permute.xlu1 %700 }
 0x641   :  { %v760_v9 = vmul.f32 0.6931472, %v977_v8  ;;  %978 = vpow2.f32 %v686_v7  ;;  %v703_v20 = vmul.f32 %v860_v1, %v701_v12 }
 0x642   :  { %980 = vpow2.f32 %v629_v17 }
 0x643   :  { %v761_v10 = vadd.f32 %v760_v9, %v748_v47 }
 0x645   :  { %v762_v11 = vsub.f32 %v1311_v43, %v761_v10 }
 0x647   :  { %v763_v13 = vmul.f32 %v762_v11, %v701_v12 }
 0x649   :  { %765 = vrot.lane.b32.xlu1 %v763_v13, %s1158_s9 }
 0x64e   :  { %v979_v14 = vpop.eup %978 }
 0x64f   :  { %v688_v15 = vsel %vm520_vm5, %v979_v14, 0.0  ;;  %v981_v18 = vpop.eup %980 }
 0x650   :  { %689 = vadd.xlane.f32.xlu0 %v688_v15  ;;  %v631_v19 = vsel %vm520_vm5, %v981_v18, 0.0 }
 0x666   :  { %613 = vperm.xlu0 %972, %v609_v51  }
 0x66a   :  { %973 = vset.pattern.permute.xlu0 %v1157_v46 }
 0x66d   :  { %632 = vadd.xlane.f32.xlu1 %v631_v19 }
 0x67e   :  { %705 = vrot.lane.b32.xlu1 %v703_v20, %s1158_s9 }
 0x6ab   :  { %v777_v21 = vpop.permute.xlu1 %776 }
 0x6ac   :  { %v779_v22 = vsel %vm520_vm5, %v777_v21, 0.0 }
 0x6ad   :  { %780 = vadd.xlane.f32.xlu0 %v779_v22 }
 0x6bb   :  { %v766_v23 = vpop.permute.xlu1 %765 }
 0x6bc   :  { %v768_v24 = vsel %vm520_vm5, %v766_v23, 0.0 }
 0x6bd   :  { %769 = vadd.xlane.f32.xlu1 %v768_v24 }
 0x6d9   :  { %v690_v25 = vpop.xlane.xlu0 %689 }
 0x6da   :  { %982 = vlog2.f32 %v690_v25 }
 0x6e1   :  { %v614_v29 = vpop.permute.xlu0 %613 }
 0x6e2   :  { %vm615_vm7 = vcmp.eq.s32.totalorder %v611_v59, %v614_v29 }
 0x6e3   :  { %v858_v34 = vsel %vm615_vm7, 1.0, %v1150_v0 }
 0x6e4   :  { %v648_v42 = vmul.f32 %v860_v1, %v858_v34 }
 0x6e6   :  { %v649_v45 = vsel %vm520_vm5, %v648_v42, 0.0 }
 0x6e7   :  { %v983_v27 = vpop.eup %982 }
 0x6e8   :  { %v692_v28 = vmul.f32 0.6931472, %v983_v27 }
 0x6ea   :  { %v693_v31 = vadd.f32 %v692_v28, %v684_v5 }
 0x6ec   :  { %v694_v36 = vsub.f32 %v1311_v43, %v693_v31 }
 0x6ee   :  { %v695_v39 = vmul.f32 %v859_v61, %v694_v36 }
 0x6f0   :  { %v696_v40 = vsel %vm520_vm5, %v695_v39, 0.0 }
 0x6f6   :  { %v633_v26 = vpop.xlane.xlu1 %632 }
 0x6f7   :  { %984 = vlog2.f32 %v633_v26 }
 0x6fa   :  { %v706_v41 = vpop.permute.xlu1 %705 }
 0x6fb   :  { %v708_v44 = vsel %vm520_vm5, %v706_v41, 0.0 }
 0x704   :  { %v985_v30 = vpop.eup %984 }
 0x705   :  { %v635_v32 = vmul.f32 0.6931472, %v985_v30 }
 0x707   :  { %v636_v33 = vadd.f32 %v635_v32, %v627_v4 }
 0x709   :  { %v637_v35 = vsub.f32 %v1322_v55, %v636_v33 }
 0x70b   :  { %v638_v37 = vmul.f32 %v858_v34, %v637_v35 }
 0x70d   :  { %v639_v38 = vsel %vm520_vm5, %v638_v37, 0.0 }
 0x70e   :  { %640 = vadd.xlane.f32.xlu1 %v639_v38 }
 0x712   :  { %697 = vadd.xlane.f32.xlu1 %v696_v40 }
 0x716   :  { %709 = vadd.xlane.f32.xlu1 %v708_v44 }
 0x71a   :  { %650 = vadd.xlane.f32.xlu1 %v649_v45 }
 0x736   :  { %v781_v0 = vpop.xlane.xlu0 %780 }
 0x737   :  { %v782_v46 = vmul.f32 %v858_v34, %v781_v0 }
 0x739   :  { %801 = vrot.lane.b32.xlu0 %v782_v46, %s1163_s2 }
 0x746   :  { %v770_v43 = vpop.xlane.xlu1 %769 }
 0x747   :  { %v783_v47 = vsub.f32 0.0, %v770_v43 }
 0x749   :  { %v784_v48 = vmul.f32 %v783_v47, %v782_v46 }
 0x74b   :  { %786 = vrot.lane.b32.xlu1 %v784_v48, %s1163_s2 }
 0x797   :  { %v641_v49 = vpop.xlane.xlu1 %640 }
 0x798   :  { %v652_v52 = vsub.f32 0.0, %v641_v49 }
 0x79b   :  { %v698_v50 = vpop.xlane.xlu1 %697 }
 0x79c   :  { %v712_v55 = vsub.f32 0.0, %v698_v50 }
 0x79f   :  { %v710_v51 = vpop.xlane.xlu1 %709 }
 0x7a0   :  { %v711_v53 = vmul.f32 %v858_v34, %v710_v51 }
 0x7a2   :  { %v713_v59 = vmul.f32 %v712_v55, %v711_v53  ;;  %v725_v61 = vsel %vm654_vm8, %v711_v53, 0.0 }
 0x7a3   :  { %v651_v54 = vpop.xlane.xlu1 %650 }
 0x7a4   :  { %v653_v56 = vmul.f32 %v652_v52, %v651_v54  ;;  %v666_v57 = vsel %vm654_vm8, %v651_v54, 0.0  ;;  %v714_v60 = vsel %vm654_vm8, %v713_v59, 0.0 }
 0x7a5   :  { %667 = vadd.xlane.f32.xlu0 %v666_v57 }
 0x7a6   :  { %v655_v58 = vsel %vm654_vm8, %v653_v56, 0.0 }
 0x7a7   :  { %656 = vadd.xlane.f32.xlu1 %v655_v58 }
 0x7ab   :  { %715 = vadd.xlane.f32.xlu1 %v714_v60  ;;  %v802_v62 = vpop.permute.xlu0 %801 }
 0x7ac   :  { %v804_v63 = vsel %vm654_vm8, %v802_v62, 0.0 }
 0x7af   :  { %726 = vadd.xlane.f32.xlu1 %v725_v61 }
 0x7b3   :  { %805 = vadd.xlane.f32.xlu1 %v804_v63 }
 0x7bd   :  { %v787_v1 = vpop.permute.xlu1 %786 }
 0x7be   :  { %v789_v2 = vsel %vm654_vm8, %v787_v1, 0.0 }
 0x7bf   :  { %790 = vadd.xlane.f32.xlu0 %v789_v2 }
 0x82e   :  { %v668_v3 = vpop.xlane.xlu0 %667 }
 0x82f   :  { %v669_v4 = vrot.slane %v668_v3, 4 }
 0x830   :  { %v657_v5 = vpop.xlane.xlu1 %656 }
 0x831   :  { %v670_v6 = vadd.f32 %v669_v4, %v668_v3  ;;  %v658_v7 = vrot.slane %v657_v5, 4 }
 0x833   :  { %v671_v8 = vrot.slane %v670_v6, 2  ;;  %v659_v9 = vadd.f32 %v658_v7, %v657_v5 }
 0x834   :  { %v716_v10 = vpop.xlane.xlu1 %715 }
 0x835   :  { %v660_v11 = vrot.slane %v659_v9, 2  ;;  %v717_v12 = vrot.slane %v716_v10, 4  ;;  %v672_v13 = vadd.f32 %v671_v8, %v670_v6 }
 0x837   :  { %v718_v14 = vadd.f32 %v717_v12, %v716_v10  ;;  %v661_v15 = vadd.f32 %v660_v11, %v659_v9  ;;  %v673_v17 = vrot.slane %v672_v13, 1 }
 0x838   :  { %v727_v16 = vpop.xlane.xlu1 %726 }
 0x839   :  { %v719_v18 = vrot.slane %v718_v14, 2  ;;  %v728_v19 = vrot.slane %v727_v16, 4  ;;  %v662_v20 = vrot.slane %v661_v15, 1  ;;  %v674_v24 = vadd.f32 %v673_v17, %v672_v13 }
 0x83b   :  { %v729_v21 = vadd.f32 %v728_v19, %v727_v16  ;;  %v663_v22 = vadd.f32 %v662_v20, %v661_v15  ;;  %v720_v23 = vadd.f32 %v719_v18, %v718_v14 }
 0x83c   :  { %v806_v26 = vpop.xlane.xlu1 %805 }
 0x83d   :  { %v730_v25 = vrot.slane %v729_v21, 2  ;;  %936 = vpush %v663_v22  ;;  %v721_v27 = vrot.slane %v720_v23, 1  ;;  %v807_v30 = vrot.slane %v806_v26, 4 }
 0x83e   :  { %938 = vpush %v674_v24 }
 0x83f   :  { %v722_v28 = vadd.f32 %v721_v27, %v720_v23  ;;  %v731_v29 = vadd.f32 %v730_v25, %v729_v21  ;;  %v808_v33 = vadd.f32 %v807_v30, %v806_v26 }
 0x841   :  { %940 = vpush %v722_v28  ;;  %v732_v31 = vrot.slane %v731_v29, 1  ;;  %v809_v34 = vrot.slane %v808_v33, 2 }
 0x843   :  { %v733_v32 = vadd.f32 %v732_v31, %v731_v29  ;;  %v810_v38 = vadd.f32 %v809_v34, %v808_v33 }
 0x845   :  { %942 = vpush %v733_v32  ;;  %v811_v41 = vrot.slane %v810_v38, 1 }
 0x847   :  { %v812_v45 = vadd.f32 %v811_v41, %v810_v38 }
 0x848   :  { %v791_v35 = vpop.xlane.xlu0 %790 }
 0x849   :  { %v792_v36 = vrot.slane %v791_v35, 4 }
 0x84b   :  { %v793_v37 = vadd.f32 %v792_v36, %v791_v35 }
 0x84d   :  { %v794_v39 = vrot.slane %v793_v37, 2 }
 0x84f   :  { %v795_v40 = vadd.f32 %v794_v39, %v793_v37 }
 0x851   :  { %v796_v42 = vrot.slane %v795_v40, 1 }
 0x853   :  { %v797_v44 = vadd.f32 %v796_v42, %v795_v40 }
 0x855   :  { %944 = vpush %v797_v44 }
 0x856   :  { %946 = vpush %v812_v45 }
 0x86e   :  { %s1359_s25 = spop %936 }
 0x86f   :  { %s939_s26 = spop %938  ;;  %v665_v7 = vstv %s1359_s25 }
 0x870   :  { %v676_v47 = vstv %s939_s26 }
 0x872   :  { %s941_s5 = spop %940 }
 0x873   :  { %v724_v61 = vstv %s941_s5 }
 0x876   :  { %s943_s27 = spop %942 }
 0x877   :  { %v735_v0 = vstv %s943_s27 }
 0x878   :  { %vm1361_vm9 = vcmp.gt.f32.partialorder %v735_v0, 0.0 }
 0x879   :  { %v737_v43 = vsel %vm1361_vm9, %v735_v0, 1.0 }
 0x87a   :  { %986 = vrcp.f32 %v737_v43 }
 0x87b   :  { %988 = vrcp.f32 %v676_v47 }
 0x886   :  { %s945_s7 = spop %944 }
 0x887   :  { %s947_s8 = spop %946  ;;  %v987_v51 = vpop.eup %986  ;;  %v799_v1 = vstv %s945_s7 }
 0x888   :  { %v814_v48 = vstv %s947_s8  ;;  %v739_v52 = vmul.f32 %v987_v51, %v737_v43  ;;  %v989_v53 = vpop.eup %988 }
 0x889   :  { %vm1367_vm10 = vcmp.gt.f32.partialorder %v814_v48, 0.0  ;;  %v678_v56 = vmul.f32 %v989_v53, %v676_v47 }
 0x88a   :  { %v816_v50 = vsel %vm1367_vm10, %v814_v48, 1.0  ;;  %v740_v54 = vsub.f32 2.0, %v739_v52 }
 0x88b   :  { %990 = vrcp.f32 %v816_v50  ;;  %v679_v60 = vsub.f32 2.0, %v678_v56 }
 0x88c   :  { %v741_v57 = vmul.f32 %v987_v51, %v740_v54 }
 0x88d   :  { %v680_v3 = vmul.f32 %v989_v53, %v679_v60 }
 0x88e   :  { %v742_v62 = vmul.f32 %v741_v57, %v724_v61 }
 0x88f   :  { %v681_v8 = vmul.f32 %v680_v3, %v665_v7 }
 0x890   :  { %v743_v4 = vsel %vm1361_vm9, %v742_v62, 0.0 }
 0x898   :  { %v991_v55 = vpop.eup %990 }
 0x899   :  { %v818_v58 = vmul.f32 %v991_v55, %v816_v50 }
 0x89b   :  { %v819_v59 = vsub.f32 2.0, %v818_v58 }
 0x89d   :  { %v820_v63 = vmul.f32 %v991_v55, %v819_v59 }
 0x89f   :  { %v821_v2 = vmul.f32 %v820_v63, %v799_v1 }
 0x8a1   :  { %v822_v5 = vsel %vm1367_vm10, %v821_v2, 0.0 }
 0x8a2   :  { %v823_v6 = vadd.f32 %v822_v5, %v743_v4 }
 0x8a4   :  { %v824_v9 = vmul.f32 0.25, %v823_v6 }
 0x8a6   :  { %v825_v10 = vadd.f32 %v824_v9, %v681_v8 }
 0x8a8   :  { %827 = vst.msk [vmem:[#allocation13] sm:$0x1] %vm826_vm11, %v825_v10 }
 0x8a9   :  { %1123 = shalt.err (!%p1120_p6)
}
 0x8aa   :  { %839 = dma.vmem_to_hbm [thread:$0]  %s837_s3, 16, %s1392_s11, [#allocation4]  }
 0x8ab   :  { %1140 = dma.done.wait [#allocation4], 16  }
 0x8ac   :  { %1141 = vsyncadd [#allocation4], 4294967280 }
 0x8ad   :  { %845 = vsyncpa [#allocation3], 1 }
 0x8ae   :  { %846 = vsyncpa [#allocation6], 1 }
 0x8af   :  { %847 = vsyncpa [#allocation9], 1 }
 0x8b0   :  { %848 = vsyncpa [#allocation12], 1 }
 0x8b1   :  { %849 = vsyncpa [#allocation4], 1 }

</bundles_post_ra>
